<compile_context>
chip_gen: v5e
topology: v5e:2x2
jax: 0.10.0
libtpu: 0.0.40
codegen_flags: <defaults>
</compile_context>

<pallas_src>
import jax
import jax.numpy as jnp
from jax.experimental import pallas as pl
from jax.experimental.pallas import tpu as pltpu

INP = 64
OUTP = 64
_LANE = 128


def _conv1x1_pixel_tiled_kernel(w_ref, b_ref, x_ref, o_ref):
    # w_ref: (Cout, Cin)  -- resident across the whole grid
    # b_ref: (Cout, 1)    -- resident across the whole grid
    # x_ref: (Cin, TP)    -- one pixel tile (lane dim = pixels)
    # o_ref: (Cout, TP)
    acc = jnp.dot(w_ref[...], x_ref[...], preferred_element_type=jnp.float32)
    o_ref[...] = (acc + b_ref[...]).astype(o_ref.dtype)


def _conv1x1_batch_blocked_kernel(w_ref, b_ref, x_ref, o_ref):
    # w_ref: (Cout, Cin); b_ref: (Cout, 1)
    # x_ref: (NB, Cin, P); o_ref: (NB, Cout, P)
    nb = x_ref.shape[0]
    w_b = jnp.broadcast_to(w_ref[...][None], (nb,) + w_ref.shape)
    # Shared batch dim 'b' -> dot_general's natural output order, no transpose.
    acc = jnp.einsum("boc,bcp->bop", w_b, x_ref[...],
                     preferred_element_type=jnp.float32)
    o_ref[...] = (acc + b_ref[...][None]).astype(o_ref.dtype)


def conv1x1(x_nchw, weight, bias, *, tp=16384,
            vmem_limit_bytes=32 * 1024 * 1024):
    """1x1 conv, stride 1, no padding, computed in native NCHW layout.

    x_nchw: (N, Cin, H, W) float32
    weight: (Cout, Cin, 1, 1) float32   (PyTorch Conv2d layout)
    bias:   (Cout,) float32
    returns (N, Cout, H, W) float32
    """
    N, Cin, H, W = x_nchw.shape
    Cout = weight.shape[0]
    assert weight.shape[1] == Cin, (weight.shape, Cin)
    P = H * W

    # Free reshapes only -- no HBM-roundtrip transposes.
    x3 = x_nchw.reshape(N, Cin, P)          # (N, Cin, P)
    w_mat = weight.reshape(Cout, Cin)       # (Cout, Cin)
    b_mat = bias.reshape(Cout, 1)           # (Cout, 1)

    # Pixel-tile budget, rounded down to a lane multiple (guards non-128
    # multiples passed by callers; keeps stores unmasked on the tiled path).
    tp_aligned = max(_LANE, (int(tp) // _LANE) * _LANE)

    cost = pl.CostEstimate(
        flops=2 * N * Cout * Cin * P,
        transcendentals=0,
        bytes_accessed=4 * (N * Cin * P + N * Cout * P + Cout * Cin + Cout))

    out_shape = jax.ShapeDtypeStruct((N, Cout, P), x_nchw.dtype)

    # How many batch elements fit in one pixel-budget-sized block.
    NB = max(1, min(N, tp_aligned // P)) if P <= tp_aligned else 1

    if NB >= 2:
        # Small-spatial path: block NB batch elements per grid step so each
        # step still moves a large DMA (instead of tiny, overhead-dominated
        # per-image transfers).
        out3 = pl.pallas_call(
            _conv1x1_batch_blocked_kernel,
            out_shape=out_shape,
            grid=(pl.cdiv(N, NB),),
            in_specs=[
                pl.BlockSpec((Cout, Cin), lambda b: (0, 0)),   # weight: resident
                pl.BlockSpec((Cout, 1), lambda b: (0, 0)),     # bias: resident
                pl.BlockSpec((NB, Cin, P), lambda b: (b, 0, 0)),
            ],
            out_specs=pl.BlockSpec((NB, Cout, P), lambda b: (b, 0, 0)),
            compiler_params=pltpu.CompilerParams(
                dimension_semantics=("parallel",),
                vmem_limit_bytes=vmem_limit_bytes),
            cost_estimate=cost,
        )(w_mat, b_mat, x3)
    else:
        # Pixel-tiled path (also covers N == 1 with small P, where TP == P).
        # Pixel-tile axis leads the grid so megacore splits the dominant axis.
        TP = P if P <= tp_aligned else tp_aligned
        out3 = pl.pallas_call(
            _conv1x1_pixel_tiled_kernel,
            out_shape=out_shape,
            grid=(pl.cdiv(P, TP), N),
            in_specs=[
                pl.BlockSpec((Cout, Cin), lambda p, n: (0, 0)),   # weight: resident
                pl.BlockSpec((Cout, 1), lambda p, n: (0, 0)),     # bias: resident
                pl.BlockSpec((None, Cin, TP), lambda p, n: (n, 0, p)),
            ],
            out_specs=pl.BlockSpec((None, Cout, TP), lambda p, n: (n, 0, p)),
            compiler_params=pltpu.CompilerParams(
                dimension_semantics=("parallel", "parallel"),
                vmem_limit_bytes=vmem_limit_bytes),
            cost_estimate=cost,
        )(w_mat, b_mat, x3)

    # Free reshape back to NCHW (channels already in place).
    return out3.reshape(N, Cout, H, W)


def conv1x1_ref(x, weight, bias):
    Cout, Cin = weight.shape[0], weight.shape[1]
    w2 = weight.reshape(Cout, Cin)
    return jnp.einsum("oc,nchw->nohw", w2, x) + bias[None, :, None, None]


if __name__ == "__main__":
    # Deterministic parameter init, mirroring the module's __init__:
    # all conv weights = 0.1, bias = 0.0
    weight = jnp.full((OUTP, INP, 1, 1), 0.1, dtype=jnp.float32)
    bias = jnp.zeros((OUTP,), dtype=jnp.float32)

    key = jax.random.PRNGKey(0)
    k1, k2, k3 = jax.random.split(key, 3)

    # Case 1: the module's own example shape (1, 64, 1, 1), perturbed.
    x1 = (jnp.ones((1, INP, 1, 1), dtype=jnp.float32) * 0.1
          + 0.01 * jax.random.normal(k1, (1, INP, 1, 1), dtype=jnp.float32))
    # Case 2: small spatial input -> batch-blocked path (NB = 2).
    x2 = 0.1 * jax.random.normal(k2, (2, INP, 16, 16), dtype=jnp.float32)
    # Case 3: forces the pixel-tiled path with a partial last tile
    # (P = 320, tp override 128 -> tiles of 128/128/64).
    x3 = 0.1 * jax.random.normal(k3, (1, INP, 16, 20), dtype=jnp.float32)

    cases = [(x1, {}), (x2, {}), (x3, {"tp": 128})]
    for x, kwargs in cases:
        y = jax.block_until_ready(conv1x1(x, weight, bias, **kwargs))
        ref = conv1x1_ref(x, weight, bias)
        assert y.shape == ref.shape, (y.shape, ref.shape)
        assert jnp.allclose(y, ref, rtol=1e-5, atol=1e-5), float(
            jnp.max(jnp.abs(y - ref)))

    print("KERNEL_OK")
</pallas_src>

<mosaic_0001>
module attributes {stable_mosaic.version = 11 : i64} {
  func.func @_conv1x1_pixel_tiled_kernel(%arg0: i32, %arg1: i32, %arg2: memref<64x64xf32, #tpu.memory_space<vmem>>, %arg3: memref<64x1xf32, #tpu.memory_space<vmem>>, %arg4: memref<1x64x1xf32, #tpu.memory_space<vmem>>, %arg5: memref<1x64x1xf32, #tpu.memory_space<vmem>>) attributes {dimension_semantics = [#tpu.dimension_semantics<parallel>, #tpu.dimension_semantics<parallel>], iteration_bounds = array<i64: 1, 1>, scalar_prefetch = 0 : i64, scratch_operands = 0 : i64, tpu.core_type = #tpu.core_type<tc>, window_params = [{pipeline_mode = #tpu.pipeline_mode<synchronous>, transform_indices = @transform_0, window_bounds = array<i64: 64, 64>}, {pipeline_mode = #tpu.pipeline_mode<synchronous>, transform_indices = @transform_1, window_bounds = array<i64: 64, 1>}, {transform_indices = @transform_2, window_bounds = array<i64: 1, 64, 1>}, {transform_indices = @transform_3, window_bounds = array<i64: 1, 64, 1>}]} {
    %c0 = arith.constant 0 : index
    %c0_0 = arith.constant 0 : index
    %0 = vector.load %arg2[%c0, %c0_0] : memref<64x64xf32, #tpu.memory_space<vmem>>, vector<64x64xf32>
    %c0_1 = arith.constant 0 : index
    %c0_2 = arith.constant 0 : index
    %c0_3 = arith.constant 0 : index
    %1 = vector.load %arg4[%c0_1, %c0_2, %c0_3] : memref<1x64x1xf32, #tpu.memory_space<vmem>>, vector<1x64x1xf32>
    %2 = vector.shape_cast %1 : vector<1x64x1xf32> to vector<64x1xf32>
    %cst = arith.constant dense<0.000000e+00> : vector<64x1xf32>
    %3 = tpu.matmul %0, %2, %cst {dimension_numbers = #tpu.dot_dimension_numbers<[1], [0], [0], [1], [0, 0, 1, 1], [], []>} : vector<64x64xf32>, vector<64x1xf32>, vector<64x1xf32> -> vector<64x1xf32>
    %c0_4 = arith.constant 0 : index
    %c0_5 = arith.constant 0 : index
    %4 = vector.load %arg3[%c0_4, %c0_5] : memref<64x1xf32, #tpu.memory_space<vmem>>, vector<64x1xf32>
    %5 = arith.addf %3, %4 : vector<64x1xf32>
    %c0_6 = arith.constant 0 : index
    %c0_7 = arith.constant 0 : index
    %c0_8 = arith.constant 0 : index
    %6 = vector.load %arg5[%c0_6, %c0_7, %c0_8] : memref<1x64x1xf32, #tpu.memory_space<vmem>>, vector<1x64x1xf32>
    %7 = vector.shape_cast %6 : vector<1x64x1xf32> to vector<64x1xf32>
    %8 = vector.shape_cast %5 : vector<64x1xf32> to vector<1x64x1xf32>
    tpu.vector_store %arg5[%c0_6, %c0_7, %c0_8], %8 {strides = array<i32>} : memref<1x64x1xf32, #tpu.memory_space<vmem>>, vector<1x64x1xf32>,
    return
  }
  func.func @transform_0(%arg0: i32, %arg1: i32) -> (i32, i32) {
    %c0_i32 = arith.constant 0 : i32
    %c0_i32_0 = arith.constant 0 : i32
    %c0_i32_1 = arith.constant 0 : i32
    return %c0_i32, %c0_i32_0 : i32, i32
  }
  func.func @transform_1(%arg0: i32, %arg1: i32) -> (i32, i32) {
    %c0_i32 = arith.constant 0 : i32
    %c0_i32_0 = arith.constant 0 : i32
    %c0_i32_1 = arith.constant 0 : i32
    return %c0_i32, %c0_i32_0 : i32, i32
  }
  func.func @transform_2(%arg0: i32, %arg1: i32) -> (i32, i32, i32) {
    %c0_i32 = arith.constant 0 : i32
    %c0_i32_0 = arith.constant 0 : i32
    return %arg1, %c0_i32, %arg0 : i32, i32, i32
  }
  func.func @transform_3(%arg0: i32, %arg1: i32) -> (i32, i32, i32) {
    %c0_i32 = arith.constant 0 : i32
    %c0_i32_0 = arith.constant 0 : i32
    return %arg1, %c0_i32, %arg0 : i32, i32, i32
  }
}

</mosaic_0001>

<bundles_post_ra>
// kernel: tpu_custom_call.1
= control target key start
LH: loop header
LB: loop body
LE: loop exit
PB: predicated region body
PF: predicated region fallthrough
CT: control target
= control target key end

     0   :  { %vm38_vm0 = vcmask 523264   ;;  %vm104_vm1 = vcmask 7168   ;;  %s281_s2 = inlined_call_operand.vmem [shape: f32[1,64,1], index: 2, kind: input, shape index: {}]   ;;  %s282_s0 = inlined_call_operand.vmem [shape: f32[64,64], index: 0, kind: input, shape index: {}]   ;;  %s283_s1 = inlined_call_operand.vmem [shape: f32[64,1], index: 1, kind: input, shape index: {}]   ;;  %s284_s3 = inlined_call_operand.vmem [shape: f32[1,64,1], index: 3, kind: output, shape index: {}]  }
   0x1   :  { %v29_v0 = vld [vmem:[%s281_s2 + $0x38] sm:$0xff]  ;;  %v28_v1 = vld [vmem:[%s281_s2 + $0x30] sm:$0xff]  ;;  %v27_v2 = vld [vmem:[%s281_s2 + $0x28] sm:$0xff] }
   0x2   :  { %126 = vmatpush.msra.mxu2 %v29_v0  ;;  %127 = vmatpush.msra.mxu3 %v29_v0  ;;  %v26_v3 = vld [vmem:[%s281_s2 + $0x20] sm:$0xff]  ;;  %v25_v4 = vld [vmem:[%s281_s2 + $0x18] sm:$0xff]  ;;  %v24_v5 = vld [vmem:[%s281_s2 + $0x10] sm:$0xff] }
   0x3   :  { %71 = vmatpush.msra.mxu0 %v29_v0  ;;  %125 = vmatpush.msra.mxu1 %v29_v0  ;;  %v23_v6 = vld [vmem:[%s281_s2 + $0x8] sm:$0xff]  ;;  %v22_v7 = vld [vmem:[%s281_s2] sm:$0xff]  ;;  %v20_v9 = vld [vmem:[%s282_s0 + $0x30] sm:$0xff] }
   0x4   :  { %129 = vmatpush.msra.mxu2 %v28_v1  ;;  %130 = vmatpush.msra.mxu3 %v28_v1  ;;  %v18_v8 = vld [vmem:[%s282_s0 + $0x20] sm:$0xff]  ;;  %v16_v11 = vld [vmem:[%s282_s0 + $0x10] sm:$0xff]  ;;  %v19_v12 = vld [vmem:[%s282_s0 + $0x28] sm:$0xff] }
   0x5   :  { %72 = vmatpush.msra.mxu0 %v28_v1  ;;  %128 = vmatpush.msra.mxu1 %v28_v1  ;;  %v14_v10 = vld [vmem:[%s282_s0] sm:$0xff]  ;;  %v21_v13 = vld [vmem:[%s282_s0 + $0x38] sm:$0xff]  ;;  %v15_v14 = vld [vmem:[%s282_s0 + $0x8] sm:$0xff] }
   0x6   :  { %132 = vmatpush.msra.mxu2 %v27_v2  ;;  %133 = vmatpush.msra.mxu3 %v27_v2  ;;  %v17_v15 = vld [vmem:[%s282_s0 + $0x18] sm:$0xff]  ;;  %v30_v16 = vld [vmem:[%s283_s1] sm:$0xff]  ;;  %v32_v17 = vld [vmem:[%s283_s1 + $0x10] sm:$0xff] }
   0x7   :  { %73 = vmatpush.msra.mxu0 %v27_v2  ;;  %131 = vmatpush.msra.mxu1 %v27_v2  ;;  %v34_v22 = vld [vmem:[%s283_s1 + $0x20] sm:$0xff]  ;;  %v36_v23 = vld [vmem:[%s283_s1 + $0x30] sm:$0xff]  ;;  %v31_v28 = vld [vmem:[%s283_s1 + $0x8] sm:$0xff] }
   0x8   :  { %135 = vmatpush.msra.mxu2 %v26_v3  ;;  %136 = vmatpush.msra.mxu3 %v26_v3  ;;  %v33_v29 = vld [vmem:[%s283_s1 + $0x18] sm:$0xff]  ;;  %v35_v34 = vld [vmem:[%s283_s1 + $0x28] sm:$0xff] }
   0x9   :  { %74 = vmatpush.msra.mxu0 %v26_v3  ;;  %134 = vmatpush.msra.mxu1 %v26_v3  ;;  %v37_v35 = vld [vmem:[%s283_s1 + $0x38] sm:$0xff] }
   0xa   :  { %138 = vmatpush.msra.mxu2 %v25_v4  ;;  %139 = vmatpush.msra.mxu3 %v25_v4 }
   0xb   :  { %75 = vmatpush.msra.mxu0 %v25_v4  ;;  %137 = vmatpush.msra.mxu1 %v25_v4 }
   0xc   :  { %141 = vmatpush.msra.mxu2 %v24_v5  ;;  %142 = vmatpush.msra.mxu3 %v24_v5 }
   0xd   :  { %76 = vmatpush.msra.mxu0 %v24_v5  ;;  %140 = vmatpush.msra.mxu1 %v24_v5 }
   0xe   :  { %144 = vmatpush.msra.mxu2 %v23_v6  ;;  %145 = vmatpush.msra.mxu3 %v23_v6 }
   0xf   :  { %77 = vmatpush.msra.mxu0 %v23_v6  ;;  %143 = vmatpush.msra.mxu1 %v23_v6 }
  0x10   :  { %147 = vmatpush.msra.mxu2 %v22_v7  ;;  %148 = vmatpush.msra.mxu3 %v22_v7 }
  0x11   :  { %121 = vmatmul.msk.f32.vlgmr.msra.gmra.mxu2 %vm38_vm0, %v18_v8  ;;  %123 = vmatmul.msk.f32.vlgmr.msra.gmra.mxu3 %vm38_vm0, %v20_v9 }
  0x12   :  { %78 = vmatpush.msra.mxu0 %v22_v7  ;;  %146 = vmatpush.msra.mxu1 %v22_v7 }
  0x13   :  { %117 = vmatmul.msk.f32.vlgmr.msra.gmra.mxu0 %vm38_vm0, %v14_v10  ;;  %119 = vmatmul.msk.f32.vlgmr.msra.gmra.mxu1 %vm38_vm0, %v16_v11 }
  0x19   :  { %122 = vmatmul.msk.f32.gmra.mxu2 %vm38_vm0, %v19_v12  ;;  %124 = vmatmul.msk.f32.gmra.mxu3 %vm38_vm0, %v21_v13 }
  0x1b   :  { %118 = vmatmul.msk.f32.gmra.mxu0 %vm38_vm0, %v15_v14  ;;  %120 = vmatmul.msk.f32.gmra.mxu1 %vm38_vm0, %v17_v15 }
  0x90   :  { %v80_v18 = vpop.f32.mrf.mxu0  ;;  %v86_v19 = vpop.f32.mrf.mxu1 }
  0x91   :  { %v81_v20 = vadd.f32 %v80_v18, %v30_v16  ;;  %v87_v21 = vadd.f32 %v86_v19, %v32_v17 }
  0x93   :  { %105 = vst.msk [vmem:[%s284_s3] sm:$0xff] %vm104_vm1, %v81_v20 }
  0x94   :  { %107 = vst.msk [vmem:[%s284_s3 + $0x10] sm:$0xff] %vm104_vm1, %v87_v21  ;;  %v92_v24 = vpop.f32.mrf.mxu2  ;;  %v98_v25 = vpop.f32.mrf.mxu3 }
  0x95   :  { %v93_v26 = vadd.f32 %v92_v24, %v34_v22  ;;  %v99_v27 = vadd.f32 %v98_v25, %v36_v23 }
  0x97   :  { %109 = vst.msk [vmem:[%s284_s3 + $0x20] sm:$0xff] %vm104_vm1, %v93_v26 }
  0x98   :  { %111 = vst.msk [vmem:[%s284_s3 + $0x30] sm:$0xff] %vm104_vm1, %v99_v27  ;;  %v83_v30 = vpop.f32.mrf.mxu0  ;;  %v89_v31 = vpop.f32.mrf.mxu1 }
  0x99   :  { %v84_v32 = vadd.f32 %v83_v30, %v31_v28  ;;  %v90_v33 = vadd.f32 %v89_v31, %v33_v29 }
  0x9b   :  { %106 = vst.msk [vmem:[%s284_s3 + $0x8] sm:$0xff] %vm104_vm1, %v84_v32 }
  0x9c   :  { %108 = vst.msk [vmem:[%s284_s3 + $0x18] sm:$0xff] %vm104_vm1, %v90_v33  ;;  %v95_v36 = vpop.f32.mrf.mxu2  ;;  %v101_v37 = vpop.f32.mrf.mxu3 }
  0x9d   :  { %v96_v38 = vadd.f32 %v95_v36, %v35_v34  ;;  %v102_v39 = vadd.f32 %v101_v37, %v37_v35 }
  0x9f   :  { %110 = vst.msk [vmem:[%s284_s3 + $0x28] sm:$0xff] %vm104_vm1, %v96_v38 }
  0xa0   :  { %112 = vst.msk [vmem:[%s284_s3 + $0x38] sm:$0xff] %vm104_vm1, %v102_v39 }

</bundles_post_ra>
